<compile_context>
chip_gen: v5e
topology: v5e:2x2
jax: 0.10.0
libtpu: 0.0.40
codegen_flags: <defaults>
</compile_context>

<pallas_src>
import numpy as np
import jax
import jax.numpy as jnp
from jax.experimental import pallas as pl
from jax.experimental.pallas import tpu as pltpu

# ----- small synthetic config (module defaults are fft=2048, mels=128) ------
FFT_LENGTH = 64
HOP_LENGTH = FFT_LENGTH // 4            # matches self.stft.hop_length = fft//4
NUM_FREQS = FFT_LENGTH // 2 + 1         # 33
NUM_MELS = 32
SAMPLE_RATE = 16000.0
EPS_WHITEN = 1.0                        # spec_whiten eps
F_PAD = ((NUM_FREQS + 127) // 128) * 128   # pad freq axis to a lane multiple (128)


# ------------------------- deterministic parameters -------------------------
def hann_window(n):
    k = np.arange(n)
    return (0.5 - 0.5 * np.cos(2.0 * np.pi * k / n)).astype(np.float32)


def dft_matrices(n_fft, n_freqs):
    n = np.arange(n_fft)[:, None]
    k = np.arange(n_freqs)[None, :]
    ang = 2.0 * np.pi * n * k / n_fft
    return np.cos(ang).astype(np.float32), (-np.sin(ang)).astype(np.float32)


def mel_filterbank(num_freqs, num_mels, sample_rate=SAMPLE_RATE, max_freq=1.0):
    # max_freq=1.0 -> fraction of Nyquist, as in MelFilterbank(max_freq=1.0)
    nyq = sample_rate / 2.0
    f_max = max_freq * nyq
    hz2mel = lambda f: 2595.0 * np.log10(1.0 + f / 700.0)
    mel2hz = lambda m: 700.0 * (10.0 ** (m / 2595.0) - 1.0)
    mel_pts = np.linspace(hz2mel(0.0), hz2mel(f_max), num_mels + 2)
    hz_pts = mel2hz(mel_pts)
    freqs = np.linspace(0.0, nyq, num_freqs)
    fb = np.zeros((num_freqs, num_mels), dtype=np.float32)
    for m in range(num_mels):
        left, center, right = hz_pts[m], hz_pts[m + 1], hz_pts[m + 2]
        up = (freqs - left) / max(center - left, 1e-6)
        down = (right - freqs) / max(right - center, 1e-6)
        fb[:, m] = np.maximum(0.0, np.minimum(up, down)).astype(np.float32)
    return fb


def build_constants():
    """Window-folded, freq-padded [cos | -sin] DFT matrix and transposed mel fb."""
    window = hann_window(FFT_LENGTH)                       # (FFT,)
    cos_m, sin_m = dft_matrices(FFT_LENGTH, NUM_FREQS)     # (FFT, F) each
    cossin = np.zeros((FFT_LENGTH, 2 * F_PAD), np.float32)
    cossin[:, :NUM_FREQS] = window[:, None] * cos_m        # real part weights
    cossin[:, F_PAD:F_PAD + NUM_FREQS] = window[:, None] * sin_m   # imag part weights
    fb = mel_filterbank(NUM_FREQS, NUM_MELS)               # (F, M)
    fbt = np.zeros((NUM_MELS, F_PAD), np.float32)          # transposed + zero padded
    fbt[:, :NUM_FREQS] = fb.T
    return jnp.asarray(cossin), jnp.asarray(fbt)


# ------------------------------ Pallas kernel --------------------------------
def melspec_whiten_kernel(wave_ref, cossin_ref, fbt_ref, out_ref):
    # wave_ref:   (1, C, T+3, HOP)  reflect-padded waveform split into hop chunks
    # cossin_ref: (FFT, 2*F_PAD)    window-folded [cos | -sin], zero cols past F
    # fbt_ref:    (M, F_PAD)        transposed mel filterbank, zero cols past F
    # out_ref:    (1, C, M, T)      whitened log-mel spectrogram (per-batch block)
    C = wave_ref.shape[1]
    HOP = wave_ref.shape[3]
    M, F_pad = fbt_ref.shape
    T = out_ref.shape[3]
    n_chunks = cossin_ref.shape[0] // HOP      # FFT // HOP == 4

    # ---- STFT: frame t spans hop chunks t..t+n_chunks-1, so
    #      re/im = sum_j wave[:, t+j, :] @ cossin[j*HOP:(j+1)*HOP, :].
    # No frames tensor is materialized; window already folded into cossin.
    reim = jnp.dot(wave_ref[0, :, 0:T, :].reshape(C * T, HOP),
                   cossin_ref[0:HOP, :], preferred_element_type=jnp.float32)
    for j in range(1, n_chunks):
        chunk = wave_ref[0, :, j:j + T, :].reshape(C * T, HOP)
        reim = reim + jnp.dot(chunk, cossin_ref[j * HOP:(j + 1) * HOP, :],
                              preferred_element_type=jnp.float32)

    re = reim[:, :F_pad]                       # (C*T, F_pad)
    im = reim[:, F_pad:]
    power = re * re + im * im                  # ComplexNorm(power=2.0)

    # ---- mel projection computed transposed so the final store is lane-dense in T.
    power_t = power.T                          # (F_pad, C*T), 128-aligned transpose
    mel_t = jnp.dot(fbt_ref[...], power_t,
                    preferred_element_type=jnp.float32)    # (M, C*T)

    # ---- spec_whiten: log10(x+1); per-batch mean / unbiased std over all elements.
    lspec = jnp.log10(mel_t + EPS_WHITEN)
    n = lspec.size
    s = jnp.sum(lspec)
    ss = jnp.sum(lspec * lspec)
    mean = s / n
    var = (ss - n * mean * mean) / (n - 1)     # torch.std: ddof=1 (one-pass form)
    inv_std = jax.lax.rsqrt(var)
    norm = (lspec - mean) * inv_std            # (M, C*T)

    for c in range(C):                         # C is a tiny compile-time constant
        out_ref[0, c] = norm[:, c * T:(c + 1) * T]


# --------------------------------- wrapper ------------------------------------
def melspectrogram_stretch(x):
    # x: (B, C, L) float32 waveform.  Returns (B, C, num_mels, T) like PyTorch.
    B, C, L = x.shape
    if L % HOP_LENGTH != 0:
        raise ValueError("signal length must be a multiple of hop_length")
    T = 1 + L // HOP_LENGTH
    pad = FFT_LENGTH // 2
    xp = jnp.pad(x, ((0, 0), (0, 0), (pad, pad)), mode="reflect")
    # Pure reshape into hop chunks (no overlap duplication, no gather):
    # L + 2*pad == (T + 3) * HOP.
    wave = xp.reshape(B, C, T + 3, HOP_LENGTH)

    cossin, fbt = build_constants()

    flops = (2 * B * C * T * FFT_LENGTH * (2 * F_PAD)      # STFT matmuls
             + 2 * B * C * T * F_PAD * NUM_MELS)           # mel matmul
    transcendentals = B * C * T * NUM_MELS                 # log10
    bytes_accessed = 4 * (wave.size + cossin.size + fbt.size + B * C * NUM_MELS * T)

    out = pl.pallas_call(
        melspec_whiten_kernel,
        out_shape=jax.ShapeDtypeStruct((B, C, NUM_MELS, T), jnp.float32),
        grid_spec=pltpu.PrefetchScalarGridSpec(
            num_scalar_prefetch=0,
            grid=(B,),
            in_specs=[
                pl.BlockSpec((1, C, T + 3, HOP_LENGTH), lambda b: (b, 0, 0, 0)),
                pl.BlockSpec((FFT_LENGTH, 2 * F_PAD), lambda b: (0, 0)),
                pl.BlockSpec((NUM_MELS, F_PAD), lambda b: (0, 0)),
            ],
            out_specs=pl.BlockSpec((1, C, NUM_MELS, T), lambda b: (b, 0, 0, 0)),
        ),
        compiler_params=pltpu.CompilerParams(
            dimension_semantics=("parallel",)),
        cost_estimate=pl.CostEstimate(
            flops=flops,
            transcendentals=transcendentals,
            bytes_accessed=bytes_accessed),
    )(wave, cossin, fbt)
    return out                                  # already (B, C, num_mels, T)


# -------------------------- pure-JAX reference --------------------------------
def reference(x):
    B, C, L = x.shape
    window = jnp.asarray(hann_window(FFT_LENGTH))
    cos_np, sin_np = dft_matrices(FFT_LENGTH, NUM_FREQS)
    cos_m, sin_m = jnp.asarray(cos_np), jnp.asarray(sin_np)
    fb = jnp.asarray(mel_filterbank(NUM_FREQS, NUM_MELS))
    pad = FFT_LENGTH // 2
    xp = jnp.pad(x, ((0, 0), (0, 0), (pad, pad)), mode="reflect")
    T = 1 + L // HOP_LENGTH
    starts = np.arange(T) * HOP_LENGTH
    idx = starts[:, None] + np.arange(FFT_LENGTH)[None, :]    # (T, FFT)
    frames = xp[:, :, idx] * window[None, None, None, :]      # (B, C, T, FFT)
    re = jnp.einsum("bctn,nf->bctf", frames, cos_m)
    im = jnp.einsum("bctn,nf->bctf", frames, sin_m)
    power = re * re + im * im
    mel = jnp.einsum("bctf,fm->bcmt", power, fb)
    lspec = jnp.log10(mel + EPS_WHITEN)
    flat = lspec.reshape(B, -1)
    mean = flat.mean(axis=1).reshape(B, 1, 1, 1)
    std = flat.std(axis=1, ddof=1).reshape(B, 1, 1, 1)
    return (lspec - mean) / std


if __name__ == "__main__":
    key = jax.random.PRNGKey(0)
    # L chosen so T = 1 + L // hop = 128  -> lane-dense (M, T) output tiles.
    B, C, L = 2, 1, 2032
    x = jax.random.normal(key, (B, C, L), dtype=jnp.float32)

    y = melspectrogram_stretch(x)
    y = jax.block_until_ready(y)

    T = 1 + L // HOP_LENGTH
    assert y.shape == (B, C, NUM_MELS, T), y.shape

    y_ref = reference(x)
    np.testing.assert_allclose(np.asarray(y), np.asarray(y_ref),
                               rtol=2e-4, atol=5e-4)
    print("KERNEL_OK")
</pallas_src>

<mosaic_0001>
module attributes {stable_mosaic.version = 11 : i64} {
  func.func @melspec_whiten_kernel(%arg0: i32, %arg1: memref<1x1x131x16xf32, #tpu.memory_space<vmem>>, %arg2: memref<64x256xf32, #tpu.memory_space<vmem>>, %arg3: memref<32x128xf32, #tpu.memory_space<vmem>>, %arg4: memref<1x1x32x128xf32, #tpu.memory_space<vmem>>) attributes {dimension_semantics = [#tpu.dimension_semantics<parallel>], iteration_bounds = array<i64: 2>, scalar_prefetch = 0 : i64, scratch_operands = 0 : i64, tpu.core_type = #tpu.core_type<tc>, window_params = [{transform_indices = @transform_0, window_bounds = array<i64: 1, 1, 131, 16>}, {pipeline_mode = #tpu.pipeline_mode<synchronous>, transform_indices = @transform_1, window_bounds = array<i64: 64, 256>}, {pipeline_mode = #tpu.pipeline_mode<synchronous>, transform_indices = @transform_2, window_bounds = array<i64: 32, 128>}, {transform_indices = @transform_3, window_bounds = array<i64: 1, 1, 32, 128>}]} {
    %c0 = arith.constant 0 : index
    %c0_0 = arith.constant 0 : index
    %c0_1 = arith.constant 0 : index
    %c0_2 = arith.constant 0 : index
    %0 = vector.load %arg1[%c0, %c0_0, %c0_1, %c0_2] : memref<1x1x131x16xf32, #tpu.memory_space<vmem>>, vector<1x1x128x16xf32>
    %1 = vector.shape_cast %0 : vector<1x1x128x16xf32> to vector<1x128x16xf32>
    %2 = vector.shape_cast %1 : vector<1x128x16xf32> to vector<128x16xf32>
    %c0_3 = arith.constant 0 : index
    %c0_4 = arith.constant 0 : index
    %3 = vector.load %arg2[%c0_3, %c0_4] : memref<64x256xf32, #tpu.memory_space<vmem>>, vector<16x256xf32>
    %cst = arith.constant dense<0.000000e+00> : vector<128x256xf32>
    %4 = tpu.matmul %2, %3, %cst {dimension_numbers = #tpu.dot_dimension_numbers<[1], [0], [0], [1], [0, 0, 1, 1], [], []>} : vector<128x16xf32>, vector<16x256xf32>, vector<128x256xf32> -> vector<128x256xf32>
    %c0_5 = arith.constant 0 : index
    %c0_6 = arith.constant 0 : index
    %c1 = arith.constant 1 : index
    %c0_7 = arith.constant 0 : index
    %5 = vector.load %arg1[%c0_5, %c0_6, %c1, %c0_7] : memref<1x1x131x16xf32, #tpu.memory_space<vmem>>, vector<1x1x128x16xf32>
    %6 = vector.shape_cast %5 : vector<1x1x128x16xf32> to vector<1x128x16xf32>
    %7 = vector.shape_cast %6 : vector<1x128x16xf32> to vector<128x16xf32>
    %c16 = arith.constant 16 : index
    %c0_8 = arith.constant 0 : index
    %8 = vector.load %arg2[%c16, %c0_8] : memref<64x256xf32, #tpu.memory_space<vmem>>, vector<16x256xf32>
    %cst_9 = arith.constant dense<0.000000e+00> : vector<128x256xf32>
    %9 = tpu.matmul %7, %8, %cst_9 {dimension_numbers = #tpu.dot_dimension_numbers<[1], [0], [0], [1], [0, 0, 1, 1], [], []>} : vector<128x16xf32>, vector<16x256xf32>, vector<128x256xf32> -> vector<128x256xf32>
    %10 = arith.addf %4, %9 : vector<128x256xf32>
    %c0_10 = arith.constant 0 : index
    %c0_11 = arith.constant 0 : index
    %c2 = arith.constant 2 : index
    %c0_12 = arith.constant 0 : index
    %11 = vector.load %arg1[%c0_10, %c0_11, %c2, %c0_12] : memref<1x1x131x16xf32, #tpu.memory_space<vmem>>, vector<1x1x128x16xf32>
    %12 = vector.shape_cast %11 : vector<1x1x128x16xf32> to vector<1x128x16xf32>
    %13 = vector.shape_cast %12 : vector<1x128x16xf32> to vector<128x16xf32>
    %c32 = arith.constant 32 : index
    %c0_13 = arith.constant 0 : index
    %14 = vector.load %arg2[%c32, %c0_13] : memref<64x256xf32, #tpu.memory_space<vmem>>, vector<16x256xf32>
    %cst_14 = arith.constant dense<0.000000e+00> : vector<128x256xf32>
    %15 = tpu.matmul %13, %14, %cst_14 {dimension_numbers = #tpu.dot_dimension_numbers<[1], [0], [0], [1], [0, 0, 1, 1], [], []>} : vector<128x16xf32>, vector<16x256xf32>, vector<128x256xf32> -> vector<128x256xf32>
    %16 = arith.addf %10, %15 : vector<128x256xf32>
    %c0_15 = arith.constant 0 : index
    %c0_16 = arith.constant 0 : index
    %c3 = arith.constant 3 : index
    %c0_17 = arith.constant 0 : index
    %17 = vector.load %arg1[%c0_15, %c0_16, %c3, %c0_17] : memref<1x1x131x16xf32, #tpu.memory_space<vmem>>, vector<1x1x128x16xf32>
    %18 = vector.shape_cast %17 : vector<1x1x128x16xf32> to vector<1x128x16xf32>
    %19 = vector.shape_cast %18 : vector<1x128x16xf32> to vector<128x16xf32>
    %c48 = arith.constant 48 : index
    %c0_18 = arith.constant 0 : index
    %20 = vector.load %arg2[%c48, %c0_18] : memref<64x256xf32, #tpu.memory_space<vmem>>, vector<16x256xf32>
    %cst_19 = arith.constant dense<0.000000e+00> : vector<128x256xf32>
    %21 = tpu.matmul %19, %20, %cst_19 {dimension_numbers = #tpu.dot_dimension_numbers<[1], [0], [0], [1], [0, 0, 1, 1], [], []>} : vector<128x16xf32>, vector<16x256xf32>, vector<128x256xf32> -> vector<128x256xf32>
    %22 = arith.addf %16, %21 : vector<128x256xf32>
    %23 = vector.extract_strided_slice %22 {offsets = [0, 0], sizes = [128, 128], strides = [1, 1]} : vector<128x256xf32> to vector<128x128xf32>
    %24 = vector.extract_strided_slice %22 {offsets = [0, 128], sizes = [128, 128], strides = [1, 1]} : vector<128x256xf32> to vector<128x128xf32>
    %25 = arith.mulf %23, %23 : vector<128x128xf32>
    %26 = arith.mulf %24, %24 : vector<128x128xf32>
    %27 = arith.addf %25, %26 : vector<128x128xf32>
    %28 = tpu.transpose %27, [1, 0] : vector<128x128xf32> -> vector<128x128xf32>
    %c0_20 = arith.constant 0 : index
    %c0_21 = arith.constant 0 : index
    %29 = vector.load %arg3[%c0_20, %c0_21] : memref<32x128xf32, #tpu.memory_space<vmem>>, vector<32x128xf32>
    %cst_22 = arith.constant dense<0.000000e+00> : vector<32x128xf32>
    %30 = tpu.matmul %29, %28, %cst_22 {dimension_numbers = #tpu.dot_dimension_numbers<[1], [0], [0], [1], [0, 0, 1, 1], [], []>} : vector<32x128xf32>, vector<128x128xf32>, vector<32x128xf32> -> vector<32x128xf32>
    %cst_23 = arith.constant 1.000000e+00 : f32
    %31 = vector.broadcast %cst_23 : f32 to vector<32x128xf32>
    %32 = arith.addf %30, %31 : vector<32x128xf32>
    %33 = math.log %32 : vector<32x128xf32>
    %cst_24 = arith.constant 0.434294492 : f32
    %34 = vector.broadcast %cst_24 : f32 to vector<32x128xf32>
    %35 = arith.mulf %33, %34 : vector<32x128xf32>
    %36 = vector.shape_cast %35 : vector<32x128xf32> to vector<1x32x128xf32>
    %cst_25 = arith.constant dense<0.000000e+00> : vector<1xf32>
    %37 = vector.multi_reduction <add>, %36, %cst_25 [1, 2] : vector<1x32x128xf32> to vector<1xf32>
    %38 = vector.shape_cast %37 : vector<1xf32> to vector<1x1x1xf32>
    %39 = vector.extract %38[0, 0, 0] : f32 from vector<1x1x1xf32>
    %40 = arith.mulf %35, %35 : vector<32x128xf32>
    %41 = vector.shape_cast %40 : vector<32x128xf32> to vector<1x32x128xf32>
    %cst_26 = arith.constant dense<0.000000e+00> : vector<1xf32>
    %42 = vector.multi_reduction <add>, %41, %cst_26 [1, 2] : vector<1x32x128xf32> to vector<1xf32>
    %43 = vector.shape_cast %42 : vector<1xf32> to vector<1x1x1xf32>
    %44 = vector.extract %43[0, 0, 0] : f32 from vector<1x1x1xf32>
    %cst_27 = arith.constant 4.096000e+03 : f32
    %45 = arith.divf %39, %cst_27 : f32
    %cst_28 = arith.constant 4.096000e+03 : f32
    %46 = arith.mulf %cst_28, %45 : f32
    %47 = arith.mulf %46, %45 : f32
    %48 = arith.subf %44, %47 : f32
    %cst_29 = arith.constant 4.095000e+03 : f32
    %49 = arith.divf %48, %cst_29 : f32
    %50 = math.rsqrt %49 : f32
    %51 = vector.broadcast %45 : f32 to vector<32x128xf32>
    %52 = arith.subf %35, %51 : vector<32x128xf32>
    %53 = vector.broadcast %50 : f32 to vector<32x128xf32>
    %54 = arith.mulf %52, %53 : vector<32x128xf32>
    %c0_30 = arith.constant 0 : index
    %c0_31 = arith.constant 0 : index
    %c0_32 = arith.constant 0 : index
    %c0_33 = arith.constant 0 : index
    %55 = vector.load %arg4[%c0_30, %c0_31, %c0_32, %c0_33] : memref<1x1x32x128xf32, #tpu.memory_space<vmem>>, vector<1x1x32x128xf32>
    %56 = vector.shape_cast %55 : vector<1x1x32x128xf32> to vector<32x128xf32>
    %57 = vector.shape_cast %54 : vector<32x128xf32> to vector<1x1x32x128xf32>
    tpu.vector_store %arg4[%c0_30, %c0_31, %c0_32, %c0_33], %57 {strides = array<i32>} : memref<1x1x32x128xf32, #tpu.memory_space<vmem>>, vector<1x1x32x128xf32>,
    return
  }
  func.func @transform_0(%arg0: i32) -> (i32, i32, i32, i32) {
    %c0_i32 = arith.constant 0 : i32
    %c0_i32_0 = arith.constant 0 : i32
    %c0_i32_1 = arith.constant 0 : i32
    %c0_i32_2 = arith.constant 0 : i32
    return %arg0, %c0_i32, %c0_i32_0, %c0_i32_1 : i32, i32, i32, i32
  }
  func.func @transform_1(%arg0: i32) -> (i32, i32) {
    %c0_i32 = arith.constant 0 : i32
    %c0_i32_0 = arith.constant 0 : i32
    %c0_i32_1 = arith.constant 0 : i32
    return %c0_i32, %c0_i32_0 : i32, i32
  }
  func.func @transform_2(%arg0: i32) -> (i32, i32) {
    %c0_i32 = arith.constant 0 : i32
    %c0_i32_0 = arith.constant 0 : i32
    %c0_i32_1 = arith.constant 0 : i32
    return %c0_i32, %c0_i32_0 : i32, i32
  }
  func.func @transform_3(%arg0: i32) -> (i32, i32, i32, i32) {
    %c0_i32 = arith.constant 0 : i32
    %c0_i32_0 = arith.constant 0 : i32
    %c0_i32_1 = arith.constant 0 : i32
    %c0_i32_2 = arith.constant 0 : i32
    return %arg0, %c0_i32, %c0_i32_0, %c0_i32_1 : i32, i32, i32, i32
  }
}

</mosaic_0001>

<bundles_post_ra>
// kernel: tpu_custom_call.1
= control target key start
LH: loop header
LB: loop body
LE: loop exit
PB: predicated region body
PF: predicated region fallthrough
CT: control target
= control target key end

     0   :  { %8 = vsyncpa [#allocation3], 0  ;;  %s2096_s0 = inlined_call_operand.vmem [shape: f32[2,1,131,16], index: 0, kind: input, shape index: {}]   ;;  %s2097_s1 = inlined_call_operand.vmem [shape: f32[64,256], index: 1, kind: input, shape index: {}]   ;;  %s2098_s2 = inlined_call_operand.vmem [shape: f32[32,128], index: 2, kind: input, shape index: {}]   ;;  %s2099_s3 = inlined_call_operand.hbm [shape: f32[2,1,32,128], index: 3, kind: output, shape index: {}]  }
   0x1   :  { %10 = vsyncpa [#allocation3 + $0x1], 0  ;;  %s1574_s12 = smov 0   ;;  %s1576_s13 = smov 0  }
   0x2   :  { %s1578_s14 = smov 0   ;;  %s1580_s15 = smov 0  }
   0x3 LB: > { %s1595_s16 = sadd.s32 4294967295, %s1548_s15   ;;  %s1272_s17 = sadd.s32 4294967294, %s1548_s15   ;;  %s1548_s15 = sphi %s1580_s15, %s2105_s15   ;;  %s1544_s14 = sphi %s1578_s14, %s2104_s14   ;;  %s1540_s13 = sphi %s1576_s13, %s2103_s13   ;;  %s1536_s12 = sphi %s1574_s12, %s2102_s12  }
   0x4   : > { %s1599_s18 = sadd.s32 1, %s1548_s15   ;;  %s91_s19 = sadd.s32 1, %s1544_s14 }
   0x5   : > { %s88_s20 = ssub.s32 %s1548_s15, %s1599_s18  ;;  %p101_p0 = scmp.ne.s32.totalorder %s1544_s14, %s1540_s13 }
   0x6   : > { %p89_p1 = scmp.eq.s32.totalorder %s88_s20, 0  ;;  %p102_p2 = scmp.eq.s32.totalorder %s1595_s16, 1 }
   0x7   : > { %p107_p3 = scmp.ne.s32.totalorder %s1540_s13, %s1536_s12  ;;  %p108_p4 = scmp.eq.s32.totalorder %s1272_s17, 1 }
   0x8   : > { %s1610_s21 = scalar_select %p89_p1, %s1544_s14, %s91_s19  }
   0x9   : > { %p1612_p5 = por %p102_p2, %p101_p0  ;;  %p1616_p6 = por %p108_p4, %p107_p3 }
   0xa   : > { %p1275_p7 = scmp.ge.s32.totalorder %s1548_s15, 1  ;;  %p140_p8 = scmp.lt.s32.totalorder %s1548_s15, 3 }
   0xc   : > { %p141_p9 = pnand %p1275_p7, %p140_p8 }
   0xd   : > { %p164_p10 = scmp.lt.s32.totalorder (!%p141_p9), %s1595_s16, 1  ;;  %s161_s25 = sand.u32 (!%p141_p9), 1, %s1540_s13  }
   0xe   : > { %144 = sbr.rel (%p141_p9) target bundleno = 926 (0x39e), region = 32  ;;  %s1411_s26 = sshll.u32 (!%p141_p9), %s1595_s16, 5 }
   0xf   : > { %s1206_s29 = scalar_lea.hbm (!%p141_p9), %s2099_s3, %s1411_s26 }
  0x13   : > { %v207_v0 = vld [vmem:[%s2097_s1 + $0x30] sm:$0xff]  ;;  %v205_v1 = vld [vmem:[%s2097_s1 + $0x20] sm:$0xff]  ;;  %s165_s28 = scalar_select %p164_p10, %s1595_s16, 1  ;;  %v208_v2 = vld [vmem:[%s2097_s1 + $0x38] sm:$0xff]  ;;  %vm209_vm0 = vcmask 130048  }
  0x14   : > { %272 = vmatpush.msra.mxu0 %v207_v0  ;;  %1412 = vmatpush.msra.mxu1 %v207_v0  ;;  %v187_v3 = vld [vmem:[%s2097_s1 + $0x10] sm:$0xff]  ;;  %v188_v4 = vld [vmem:[%s2097_s1 + $0x18] sm:$0xff]  ;;  %v206_v5 = vld [vmem:[%s2097_s1 + $0x28] sm:$0xff]  ;;  %s1195_s16 = scalar_lea.sflag [#allocation3], %s161_s25 }
  0x15   : > { %1413 = vmatpush.msra.mxu2 %v207_v0  ;;  %1414 = vmatpush.msra.mxu3 %v207_v0  ;;  %s1418_s8 = smul.u32 136, %s165_s28  ;;  %v185_v6 = vld [vmem:[%s2097_s1] sm:$0xff]  ;;  %v186_v7 = vld [vmem:[%s2097_s1 + $0x8] sm:$0xff]  ;;  %v814_v22 = vld [vmem:[%s2097_s1 + $0x70] sm:$0xff] }
  0x16   : > { %273 = vmatpush.msra.mxu0 %v205_v1  ;;  %1415 = vmatpush.msra.mxu1 %v205_v1  ;;  %v815_v23 = vld [vmem:[%s2097_s1 + $0x78] sm:$0xff]  ;;  %v584_v31 = vld [vmem:[%s2097_s1 + $0x50] sm:$0xff]  ;;  %v582_v32 = vld [vmem:[%s2097_s1 + $0x40] sm:$0xff] }
  0x17   : > { %1416 = vmatpush.msra.mxu2 %v205_v1  ;;  %1417 = vmatpush.msra.mxu3 %v205_v1  ;;  %s1648_s24 = scalar_lea.vmem %s2096_s0, %s1418_s8  ;;  %v585_v24 = vld [vmem:[%s2097_s1 + $0x58] sm:$0xff]  ;;  %v583_v42 = vld [vmem:[%s2097_s1 + $0x48] sm:$0xff]  ;;  %v812_v43 = vld [vmem:[%s2097_s1 + $0x60] sm:$0xff] }
  0x18   : > { %337 = vmatpush.msrb.mxu1 %v208_v2  ;;  %v189_v8 = vld [vmem:[%s1648_s24 + $0x1] sm:$0xff]  ;;  %v1655_v9 = vld [vmem:[%s1648_s24 + $0x69] sm:$0xff]  ;;  %v1658_v10 = vld [vmem:[%s1648_s24 + $0x71] sm:$0xff]  ;;  %648 = vmatpush.msrb.mxu0 %v584_v31 }
  0x19   : > { %450 = vmatpush.msrb.mxu2 %v187_v3  ;;  %515 = vmatpush.msrb.mxu3 %v188_v4  ;;  %v1664_v11 = vld [vmem:[%s1648_s24 + $0x79] sm:$0xff]  ;;  %v190_v12 = vld [vmem:[%s1648_s24 + $0x9] sm:$0xff]  ;;  %v191_v14 = vld [vmem:[%s1648_s24 + $0x11] sm:$0xff] }
  0x1a   : > { %338 = vmatpush.msrb.mxu1 %v206_v5  ;;  %1278 = vmatmul.msk.f32.vlgmr.msra.gmra.mxu0 %vm209_vm0, %v189_v8  ;;  %v169_v13 = vld [vmem:[%s1648_s24] sm:$0xff]  ;;  %v170_v15 = vld [vmem:[%s1648_s24 + $0x8] sm:$0xff]  ;;  %v171_v17 = vld [vmem:[%s1648_s24 + $0x10] sm:$0xff] }
  0x1b   : > { %451 = vmatpush.msrb.mxu2 %v185_v6  ;;  %1291 = vmatmul.msk.f32.vlgmr.msra.gmra.mxu1 %vm209_vm0, %v1655_v9  ;;  %v192_v16 = vld [vmem:[%s1648_s24 + $0x19] sm:$0xff]  ;;  %v193_v18 = vld [vmem:[%s1648_s24 + $0x21] sm:$0xff]  ;;  %v194_v20 = vld [vmem:[%s1648_s24 + $0x29] sm:$0xff] }
  0x1c   : > { %1292 = vmatmul.msk.f32.vlgmr.msra.gmra.mxu2 %vm209_vm0, %v1658_v10  ;;  %1293 = vmatmul.msk.f32.vlgmr.msra.gmra.mxu3 %vm209_vm0, %v1664_v11  ;;  %v172_v19 = vld [vmem:[%s1648_s24 + $0x18] sm:$0xff]  ;;  %v173_v21 = vld [vmem:[%s1648_s24 + $0x20] sm:$0xff]  ;;  %v174_v26 = vld [vmem:[%s1648_s24 + $0x28] sm:$0xff] }
  0x1d   : > { %516 = vmatpush.msrb.mxu3 %v186_v7  ;;  %878 = vmatpush.msra.mxu2 %v814_v22  ;;  %v195_v25 = vld [vmem:[%s1648_s24 + $0x31] sm:$0xff]  ;;  %v196_v27 = vld [vmem:[%s1648_s24 + $0x39] sm:$0xff]  ;;  %v197_v29 = vld [vmem:[%s1648_s24 + $0x41] sm:$0xff] }
  0x1e   : > { %713 = vmatpush.msra.mxu1 %v585_v24  ;;  %v175_v28 = vld [vmem:[%s1648_s24 + $0x30] sm:$0xff]  ;;  %v176_v30 = vld [vmem:[%s1648_s24 + $0x38] sm:$0xff]  ;;  %649 = vmatpush.msrb.mxu0 %v582_v32  ;;  %v177_v34 = vld [vmem:[%s1648_s24 + $0x40] sm:$0xff] }
  0x1f   : > { %943 = vmatpush.msra.mxu3 %v815_v23  ;;  %v198_v33 = vld [vmem:[%s1648_s24 + $0x49] sm:$0xff]  ;;  %v199_v35 = vld [vmem:[%s1648_s24 + $0x51] sm:$0xff]  ;;  %v200_v37 = vld [vmem:[%s1648_s24 + $0x59] sm:$0xff]  ;;  %879 = vmatpush.msra.mxu2 %v812_v43 }
  0x20   : > { %v178_v36 = vld [vmem:[%s1648_s24 + $0x48] sm:$0xff]  ;;  %v179_v38 = vld [vmem:[%s1648_s24 + $0x50] sm:$0xff]  ;;  %v180_v40 = vld [vmem:[%s1648_s24 + $0x58] sm:$0xff]  ;;  %714 = vmatpush.msra.mxu1 %v583_v42 }
  0x21   : > { %v201_v39 = vld [vmem:[%s1648_s24 + $0x61] sm:$0xff]  ;;  %v567_v46 = vld [vmem:[%s1648_s24 + $0xa] sm:$0xff]  ;;  %v568_v48 = vld [vmem:[%s1648_s24 + $0x12] sm:$0xff] }
  0x22   : > { %1279 = vmatmul.msk.f32.gmra.mxu0 %vm209_vm0, %v190_v12  ;;  %v566_v41 = vld [vmem:[%s1648_s24 + $0x2] sm:$0xff]  ;;  %v183_v49 = vld [vmem:[%s1648_s24 + $0x70] sm:$0xff]  ;;  %v569_v52 = vld [vmem:[%s1648_s24 + $0x1a] sm:$0xff] }
  0x23   : > { %1294 = vmatmul.msk.f32.vlgmr.msrb.gmra.mxu1 %vm209_vm0, %v189_v8  ;;  %v813_v44 = vld [vmem:[%s2097_s1 + $0x68] sm:$0xff]  ;;  %v181_v45 = vld [vmem:[%s1648_s24 + $0x60] sm:$0xff]  ;;  %v184_v53 = vld [vmem:[%s1648_s24 + $0x78] sm:$0xff] }
  0x24   : > { %1310 = vmatmul.msk.f32.vlgmr.msrb.gmra.mxu2 %vm209_vm0, %v169_v13  ;;  %1326 = vmatmul.msk.f32.vlgmr.msrb.gmra.mxu3 %vm209_vm0, %v169_v13  ;;  %v182_v47 = vld [vmem:[%s1648_s24 + $0x68] sm:$0xff]  ;;  %v802_v42 = vld [vmem:[%s1648_s24 + $0x33] sm:$0xff] }
  0x25   : > { %944 = vmatpush.msra.mxu3 %v813_v44  ;;  %v570_v58 = vld [vmem:[%s1648_s24 + $0x22] sm:$0xff]  ;;  %v571_v2 = vld [vmem:[%s1648_s24 + $0x2a] sm:$0xff] }
  0x26   : > { %v796_v59 = vld [vmem:[%s1648_s24 + $0x3] sm:$0xff]  ;;  %v797_v3 = vld [vmem:[%s1648_s24 + $0xb] sm:$0xff] }
  0x2a   : > { %1280 = vmatmul.msk.f32.gmra.mxu0 %vm209_vm0, %v191_v14 }
  0x2b   : > { %1295 = vmatmul.msk.f32.gmra.mxu1 %vm209_vm0, %v190_v12 }
  0x2c   : > { %1311 = vmatmul.msk.f32.gmra.mxu2 %vm209_vm0, %v170_v15  ;;  %1327 = vmatmul.msk.f32.gmra.mxu3 %vm209_vm0, %v170_v15 }
  0x32   : > { %1281 = vmatmul.msk.f32.gmra.mxu0 %vm209_vm0, %v192_v16 }
  0x33   : > { %1296 = vmatmul.msk.f32.gmra.mxu1 %vm209_vm0, %v191_v14 }
  0x34   : > { %1312 = vmatmul.msk.f32.gmra.mxu2 %vm209_vm0, %v171_v17  ;;  %1328 = vmatmul.msk.f32.gmra.mxu3 %vm209_vm0, %v171_v17 }
  0x3a   : > { %1282 = vmatmul.msk.f32.gmra.mxu0 %vm209_vm0, %v193_v18 }
  0x3b   : > { %1297 = vmatmul.msk.f32.gmra.mxu1 %vm209_vm0, %v192_v16 }
  0x3c   : > { %1313 = vmatmul.msk.f32.gmra.mxu2 %vm209_vm0, %v172_v19  ;;  %1329 = vmatmul.msk.f32.gmra.mxu3 %vm209_vm0, %v172_v19  ;;  %v799_v19 = vld [vmem:[%s1648_s24 + $0x1b] sm:$0xff] }
  0x42   : > { %1283 = vmatmul.msk.f32.gmra.mxu0 %vm209_vm0, %v194_v20 }
  0x43   : > { %1298 = vmatmul.msk.f32.gmra.mxu1 %vm209_vm0, %v193_v18  ;;  %v573_v18 = vld [vmem:[%s1648_s24 + $0x3a] sm:$0xff] }
  0x44   : > { %1314 = vmatmul.msk.f32.gmra.mxu2 %vm209_vm0, %v173_v21  ;;  %1330 = vmatmul.msk.f32.gmra.mxu3 %vm209_vm0, %v173_v21 }
  0x4a   : > { %1284 = vmatmul.msk.f32.gmra.mxu0 %vm209_vm0, %v195_v25 }
  0x4b   : > { %1299 = vmatmul.msk.f32.gmra.mxu1 %vm209_vm0, %v194_v20 }
  0x4c   : > { %1315 = vmatmul.msk.f32.gmra.mxu2 %vm209_vm0, %v174_v26  ;;  %1331 = vmatmul.msk.f32.gmra.mxu3 %vm209_vm0, %v174_v26  ;;  %v574_v26 = vld [vmem:[%s1648_s24 + $0x42] sm:$0xff] }
  0x52   : > { %1285 = vmatmul.msk.f32.gmra.mxu0 %vm209_vm0, %v196_v27 }
  0x53   : > { %1300 = vmatmul.msk.f32.gmra.mxu1 %vm209_vm0, %v195_v25 }
  0x54   : > { %1316 = vmatmul.msk.f32.gmra.mxu2 %vm209_vm0, %v175_v28  ;;  %1332 = vmatmul.msk.f32.gmra.mxu3 %vm209_vm0, %v175_v28 }
  0x5a   : > { %1286 = vmatmul.msk.f32.gmra.mxu0 %vm209_vm0, %v197_v29 }
  0x5b   : > { %1301 = vmatmul.msk.f32.gmra.mxu1 %vm209_vm0, %v196_v27  ;;  %v800_v27 = vld [vmem:[%s1648_s24 + $0x23] sm:$0xff] }
  0x5c   : > { %1317 = vmatmul.msk.f32.gmra.mxu2 %vm209_vm0, %v176_v30  ;;  %1333 = vmatmul.msk.f32.gmra.mxu3 %vm209_vm0, %v176_v30 }
  0x62   : > { %1287 = vmatmul.msk.f32.gmra.mxu0 %vm209_vm0, %v198_v33 }
  0x63   : > { %1302 = vmatmul.msk.f32.gmra.mxu1 %vm209_vm0, %v197_v29 }
  0x64   : > { %1318 = vmatmul.msk.f32.gmra.mxu2 %vm209_vm0, %v177_v34  ;;  %1334 = vmatmul.msk.f32.gmra.mxu3 %vm209_vm0, %v177_v34  ;;  %v575_v34 = vld [vmem:[%s1648_s24 + $0x4a] sm:$0xff] }
  0x6a   : > { %1288 = vmatmul.msk.f32.gmra.mxu0 %vm209_vm0, %v199_v35 }
  0x6b   : > { %1303 = vmatmul.msk.f32.gmra.mxu1 %vm209_vm0, %v198_v33 }
  0x6c   : > { %1319 = vmatmul.msk.f32.gmra.mxu2 %vm209_vm0, %v178_v36  ;;  %1335 = vmatmul.msk.f32.gmra.mxu3 %vm209_vm0, %v178_v36 }
  0x72   : > { %1289 = vmatmul.msk.f32.gmra.mxu0 %vm209_vm0, %v200_v37 }
  0x73   : > { %1304 = vmatmul.msk.f32.gmra.mxu1 %vm209_vm0, %v199_v35  ;;  %v801_v35 = vld [vmem:[%s1648_s24 + $0x2b] sm:$0xff] }
  0x74   : > { %1320 = vmatmul.msk.f32.gmra.mxu2 %vm209_vm0, %v179_v38  ;;  %1336 = vmatmul.msk.f32.gmra.mxu3 %vm209_vm0, %v179_v38 }
  0x7a   : > { %1290 = vmatmul.msk.f32.gmra.mxu0 %vm209_vm0, %v201_v39 }
  0x7b   : > { %1305 = vmatmul.msk.f32.gmra.mxu1 %vm209_vm0, %v200_v37 }
  0x7c   : > { %1321 = vmatmul.msk.f32.gmra.mxu2 %vm209_vm0, %v180_v40  ;;  %1337 = vmatmul.msk.f32.gmra.mxu3 %vm209_vm0, %v180_v40 }
  0x82   : > { %1342 = vmatmul.msk.f32.vlgmr.msrb.gmra.mxu0 %vm209_vm0, %v566_v41 }
  0x83   : > { %1306 = vmatmul.msk.f32.gmra.mxu1 %vm209_vm0, %v201_v39 }
  0x84   : > { %1322 = vmatmul.msk.f32.gmra.mxu2 %vm209_vm0, %v181_v45  ;;  %1338 = vmatmul.msk.f32.gmra.mxu3 %vm209_vm0, %v181_v45 }
  0x8a   : > { %1343 = vmatmul.msk.f32.gmra.mxu0 %vm209_vm0, %v567_v46 }
  0x8b   : > { %1307 = vmatmul.msk.f32.gmra.mxu1 %vm209_vm0, %v1655_v9 }
  0x8c   : > { %1323 = vmatmul.msk.f32.gmra.mxu2 %vm209_vm0, %v182_v47  ;;  %1339 = vmatmul.msk.f32.gmra.mxu3 %vm209_vm0, %v182_v47 }
  0x92   : > { %1344 = vmatmul.msk.f32.gmra.mxu0 %vm209_vm0, %v568_v48 }
  0x93   : > { %1308 = vmatmul.msk.f32.gmra.mxu1 %vm209_vm0, %v1658_v10  ;;  %v572_v10 = vld [vmem:[%s1648_s24 + $0x32] sm:$0xff] }
  0x94   : > { %1324 = vmatmul.msk.f32.gmra.mxu2 %vm209_vm0, %v183_v49  ;;  %1340 = vmatmul.msk.f32.gmra.mxu3 %vm209_vm0, %v183_v49  ;;  %v803_v49 = vld [vmem:[%s1648_s24 + $0x3b] sm:$0xff] }
  0x97   : > { %v275_v50 = vpop.f32.mrf.mxu0 }
  0x98   : > { %v1786_v51 = vpop.f32.mrf.mxu1 }
  0x9a   : > { %1345 = vmatmul.msk.f32.gmra.mxu0 %vm209_vm0, %v569_v52 }
  0x9b   : > { %1309 = vmatmul.msk.f32.gmra.mxu1 %vm209_vm0, %v1664_v11  ;;  %v798_v11 = vld [vmem:[%s1648_s24 + $0x13] sm:$0xff] }
  0x9c   : > { %1325 = vmatmul.msk.f32.gmra.mxu2 %vm209_vm0, %v184_v53  ;;  %1341 = vmatmul.msk.f32.gmra.mxu3 %vm209_vm0, %v184_v53 }
  0x9f   : > { %v1795_v54 = vpop.f32.mrf.mxu2  ;;  %v1797_v55 = vpop.f32.mrf.mxu3 }
  0xa0   : > { %v278_v56 = vpop.f32.mrf.mxu0  ;;  %v340_v57 = vpop.f32.mrf.mxu1 }
  0xa2   : > { %1346 = vmatmul.msk.f32.gmra.mxu0 %vm209_vm0, %v570_v58 }
  0xa3   : > { %1358 = vmatmul.msk.f32.vlgmr.msra.gmra.mxu1 %vm209_vm0, %v566_v41  ;;  %v576_v41 = vld [vmem:[%s1648_s24 + $0x52] sm:$0xff] }
  0xa4   : > { %1374 = vmatmul.msk.f32.vlgmr.msra.gmra.mxu2 %vm209_vm0, %v796_v59  ;;  %1390 = vmatmul.msk.f32.vlgmr.msra.gmra.mxu3 %vm209_vm0, %v796_v59  ;;  %v804_v59 = vld [vmem:[%s1648_s24 + $0x43] sm:$0xff] }
  0xa7   : > { %v453_v60 = vpop.f32.mrf.mxu2  ;;  %v518_v61 = vpop.f32.mrf.mxu3 }
  0xa8   : > { %v1805_v62 = vadd.f32 %v453_v60, %v275_v50  ;;  %v1807_v63 = vadd.f32 %v518_v61, %v340_v57  ;;  %v281_v0 = vpop.f32.mrf.mxu0  ;;  %v343_v1 = vpop.f32.mrf.mxu1 }
  0xaa   : > { %1347 = vmatmul.msk.f32.gmra.mxu0 %vm209_vm0, %v571_v2 }
  0xab   : > { %1359 = vmatmul.msk.f32.gmra.mxu1 %vm209_vm0, %v567_v46 }
  0xac   : > { %1375 = vmatmul.msk.f32.gmra.mxu2 %vm209_vm0, %v797_v3  ;;  %1391 = vmatmul.msk.f32.gmra.mxu3 %vm209_vm0, %v797_v3  ;;  %v579_v3 = vld [vmem:[%s1648_s24 + $0x6a] sm:$0xff] }
  0xaf   : > { %v456_v4 = vpop.f32.mrf.mxu2  ;;  %v521_v5 = vpop.f32.mrf.mxu3 }
  0xb0   : > { %v1815_v6 = vadd.f32 %v456_v4, %v278_v56  ;;  %v1817_v7 = vadd.f32 %v521_v5, %v343_v1  ;;  %v284_v8 = vpop.f32.mrf.mxu0  ;;  %v346_v9 = vpop.f32.mrf.mxu1  ;;  %v805_v4 = vld [vmem:[%s1648_s24 + $0x4b] sm:$0xff] }
  0xb2   : > { %1348 = vmatmul.msk.f32.gmra.mxu0 %vm209_vm0, %v572_v10 }
  0xb3   : > { %1360 = vmatmul.msk.f32.gmra.mxu1 %vm209_vm0, %v568_v48  ;;  %v577_v48 = vld [vmem:[%s1648_s24 + $0x5a] sm:$0xff] }
  0xb4   : > { %1376 = vmatmul.msk.f32.gmra.mxu2 %vm209_vm0, %v798_v11  ;;  %1392 = vmatmul.msk.f32.gmra.mxu3 %vm209_vm0, %v798_v11 }
  0xb7   : > { %v459_v12 = vpop.f32.mrf.mxu2  ;;  %v524_v13 = vpop.f32.mrf.mxu3 }
  0xb8   : > { %v1825_v14 = vadd.f32 %v459_v12, %v281_v0  ;;  %v1827_v15 = vadd.f32 %v524_v13, %v346_v9  ;;  %v287_v16 = vpop.f32.mrf.mxu0  ;;  %v349_v17 = vpop.f32.mrf.mxu1  ;;  %v580_v13 = vld [vmem:[%s1648_s24 + $0x72] sm:$0xff] }
  0xba   : > { %1349 = vmatmul.msk.f32.gmra.mxu0 %vm209_vm0, %v573_v18 }
  0xbb   : > { %1361 = vmatmul.msk.f32.gmra.mxu1 %vm209_vm0, %v569_v52 }
  0xbc   : > { %1377 = vmatmul.msk.f32.gmra.mxu2 %vm209_vm0, %v799_v19  ;;  %1393 = vmatmul.msk.f32.gmra.mxu3 %vm209_vm0, %v799_v19 }
  0xbf   : > { %v462_v20 = vpop.f32.mrf.mxu2  ;;  %v527_v21 = vpop.f32.mrf.mxu3 }
  0xc0   : > { %v1835_v22 = vadd.f32 %v462_v20, %v284_v8  ;;  %v1837_v23 = vadd.f32 %v527_v21, %v349_v17  ;;  %v1839_v24 = vpop.f32.mrf.mxu0  ;;  %v352_v25 = vpop.f32.mrf.mxu1 }
  0xc2   : > { %1350 = vmatmul.msk.f32.gmra.mxu0 %vm209_vm0, %v574_v26 }
  0xc3   : > { %1362 = vmatmul.msk.f32.gmra.mxu1 %vm209_vm0, %v570_v58  ;;  %v578_v58 = vld [vmem:[%s1648_s24 + $0x62] sm:$0xff] }
  0xc4   : > { %1378 = vmatmul.msk.f32.gmra.mxu2 %vm209_vm0, %v800_v27  ;;  %1394 = vmatmul.msk.f32.gmra.mxu3 %vm209_vm0, %v800_v27  ;;  %v807_v27 = vld [vmem:[%s1648_s24 + $0x5b] sm:$0xff] }
  0xc7   : > { %v465_v28 = vpop.f32.mrf.mxu2  ;;  %v530_v29 = vpop.f32.mrf.mxu3 }
  0xc8   : > { %v1847_v30 = vadd.f32 %v465_v28, %v287_v16  ;;  %v1849_v31 = vadd.f32 %v530_v29, %v352_v25  ;;  %v1851_v32 = vpop.f32.mrf.mxu0  ;;  %v355_v33 = vpop.f32.mrf.mxu1  ;;  %v806_v16 = vld [vmem:[%s1648_s24 + $0x53] sm:$0xff] }
  0xca   : > { %1351 = vmatmul.msk.f32.gmra.mxu0 %vm209_vm0, %v575_v34 }
  0xcb   : > { %1363 = vmatmul.msk.f32.gmra.mxu1 %vm209_vm0, %v571_v2 }
  0xcc   : > { %1379 = vmatmul.msk.f32.gmra.mxu2 %vm209_vm0, %v801_v35  ;;  %1395 = vmatmul.msk.f32.gmra.mxu3 %vm209_vm0, %v801_v35 }
  0xcf   : > { %v1859_v36 = vpop.f32.mrf.mxu2  ;;  %v533_v37 = vpop.f32.mrf.mxu3 }
  0xd0   : > { %v1861_v38 = vadd.f32 %v533_v37, %v355_v33  ;;  %v1863_v39 = vpop.f32.mrf.mxu0  ;;  %v358_v40 = vpop.f32.mrf.mxu1 }
  0xd2   : > { %1352 = vmatmul.msk.f32.gmra.mxu0 %vm209_vm0, %v576_v41 }
  0xd3   : > { %1364 = vmatmul.msk.f32.gmra.mxu1 %vm209_vm0, %v572_v10 }
  0xd4   : > { %1380 = vmatmul.msk.f32.gmra.mxu2 %vm209_vm0, %v802_v42  ;;  %1396 = vmatmul.msk.f32.gmra.mxu3 %vm209_vm0, %v802_v42 }
  0xd7   : > { %v1871_v43 = vpop.f32.mrf.mxu2  ;;  %v536_v44 = vpop.f32.mrf.mxu3 }
  0xd8   : > { %v1873_v45 = vadd.f32 %v536_v44, %v358_v40  ;;  %v1875_v46 = vpop.f32.mrf.mxu0  ;;  %v361_v47 = vpop.f32.mrf.mxu1 }
  0xda   : > { %1353 = vmatmul.msk.f32.gmra.mxu0 %vm209_vm0, %v577_v48 }
  0xdb   : > { %1365 = vmatmul.msk.f32.gmra.mxu1 %vm209_vm0, %v573_v18 }
  0xdc   : > { %1381 = vmatmul.msk.f32.gmra.mxu2 %vm209_vm0, %v803_v49  ;;  %1397 = vmatmul.msk.f32.gmra.mxu3 %vm209_vm0, %v803_v49 }
  0xdf   : > { %v1883_v50 = vpop.f32.mrf.mxu2  ;;  %v539_v52 = vpop.f32.mrf.mxu3 }
  0xe0   : > { %v1885_v53 = vadd.f32 %v539_v52, %v361_v47  ;;  %v302_v56 = vpop.f32.mrf.mxu0  ;;  %v364_v57 = vpop.f32.mrf.mxu1 }
  0xe2   : > { %1354 = vmatmul.msk.f32.gmra.mxu0 %vm209_vm0, %v578_v58 }
  0xe3   : > { %1366 = vmatmul.msk.f32.gmra.mxu1 %vm209_vm0, %v574_v26  ;;  %v581_v26 = vld [vmem:[%s1648_s24 + $0x7a] sm:$0xff] }
  0xe4   : > { %1382 = vmatmul.msk.f32.gmra.mxu2 %vm209_vm0, %v804_v59  ;;  %1398 = vmatmul.msk.f32.gmra.mxu3 %vm209_vm0, %v804_v59 }
  0xe7   : > { %v1893_v60 = vpop.f32.mrf.mxu2  ;;  %v542_v61 = vpop.f32.mrf.mxu3 }
  0xe8   : > { %v1895_v0 = vadd.f32 %v542_v61, %v364_v57  ;;  %v305_v1 = vpop.f32.mrf.mxu0  ;;  %v367_v2 = vpop.f32.mrf.mxu1  ;;  %v809_v57 = vld [vmem:[%s1648_s24 + $0x6b] sm:$0xff] }
  0xea   : > { %1355 = vmatmul.msk.f32.gmra.mxu0 %vm209_vm0, %v579_v3 }
  0xeb   : > { %1367 = vmatmul.msk.f32.gmra.mxu1 %vm209_vm0, %v575_v34 }
  0xec   : > { %1383 = vmatmul.msk.f32.gmra.mxu2 %vm209_vm0, %v805_v4  ;;  %1399 = vmatmul.msk.f32.gmra.mxu3 %vm209_vm0, %v805_v4  ;;  %v810_v4 = vld [vmem:[%s1648_s24 + $0x73] sm:$0xff] }
  0xef   : > { %v480_v5 = vpop.f32.mrf.mxu2  ;;  %v545_v8 = vpop.f32.mrf.mxu3 }
  0xf0   : > { %v1903_v9 = vadd.f32 %v480_v5, %v302_v56  ;;  %v1905_v10 = vadd.f32 %v545_v8, %v367_v2  ;;  %v308_v11 = vpop.f32.mrf.mxu0  ;;  %v370_v12 = vpop.f32.mrf.mxu1 }
  0xf2   : > { %1356 = vmatmul.msk.f32.gmra.mxu0 %vm209_vm0, %v580_v13 }
  0xf3   : > { %1368 = vmatmul.msk.f32.gmra.mxu1 %vm209_vm0, %v576_v41  ;;  %v808_v41 = vld [vmem:[%s1648_s24 + $0x63] sm:$0xff] }
  0xf4   : > { %1384 = vmatmul.msk.f32.gmra.mxu2 %vm209_vm0, %v806_v16  ;;  %1400 = vmatmul.msk.f32.gmra.mxu3 %vm209_vm0, %v806_v16  ;;  %v811_v16 = vld [vmem:[%s1648_s24 + $0x7b] sm:$0xff]  ;;  %s1276_s24 = sshll.u32 %s161_s25, 5 }
  0xf5   : > { %s163_s4 = scalar_lea.vmem [#allocation2], %s1276_s24 }
  0xf6   : > { %s1207_s5 = sshll.u32 %s163_s4, 4  ;;  %s1208_s5 = int_to_ptr.vmem [resolvable:$true] %s1207_s5 }
  0xf7   : > { %v483_v17 = vpop.f32.mrf.mxu2  ;;  %v548_v18 = vpop.f32.mrf.mxu3 }
  0xf8   : > { %v1913_v19 = vadd.f32 %v483_v17, %v305_v1  ;;  %v1915_v20 = vadd.f32 %v548_v18, %v370_v12  ;;  %v311_v21 = vpop.f32.mrf.mxu0  ;;  %v373_v25 = vpop.f32.mrf.mxu1 }
  0xfa   : > { %1357 = vmatmul.msk.f32.gmra.mxu0 %vm209_vm0, %v581_v26 }
  0xfb   : > { %1369 = vmatmul.msk.f32.gmra.mxu1 %vm209_vm0, %v577_v48 }
  0xfc   : > { %1385 = vmatmul.msk.f32.gmra.mxu2 %vm209_vm0, %v807_v27  ;;  %1401 = vmatmul.msk.f32.gmra.mxu3 %vm209_vm0, %v807_v27 }
  0xff   : > { %v486_v28 = vpop.f32.mrf.mxu2  ;;  %v551_v29 = vpop.f32.mrf.mxu3 }
 0x100   : > { %v1923_v33 = vadd.f32 %v486_v28, %v308_v11  ;;  %v1925_v34 = vadd.f32 %v551_v29, %v373_v25  ;;  %v376_v35 = vpop.f32.mrf.mxu1  ;;  %v651_v37 = vpop.f32.mrf.mxu0 }
 0x101   : > { %v764_v40 = vadd.f32 %v651_v37, %v1805_v62 }
 0x103   : > { %1370 = vmatmul.msk.f32.gmra.mxu1 %vm209_vm0, %v578_v58 }
 0x104   : > { %1386 = vmatmul.msk.f32.gmra.mxu2 %vm209_vm0, %v808_v41  ;;  %1402 = vmatmul.msk.f32.gmra.mxu3 %vm209_vm0, %v808_v41 }
 0x107   : > { %v489_v42 = vpop.f32.mrf.mxu2  ;;  %v554_v44 = vpop.f32.mrf.mxu3 }
 0x108   : > { %v1932_v47 = vadd.f32 %v489_v42, %v311_v21  ;;  %v1934_v48 = vadd.f32 %v554_v44, %v376_v35  ;;  %v379_v49 = vpop.f32.mrf.mxu1  ;;  %v654_v52 = vpop.f32.mrf.mxu0 }
 0x109   : > { %v766_v56 = vadd.f32 %v654_v52, %v1815_v6 }
 0x10b   : > { %1371 = vmatmul.msk.f32.gmra.mxu1 %vm209_vm0, %v579_v3 }
 0x10c   : > { %1387 = vmatmul.msk.f32.gmra.mxu2 %vm209_vm0, %v809_v57  ;;  %1403 = vmatmul.msk.f32.gmra.mxu3 %vm209_vm0, %v809_v57 }
 0x10f   : > { %v1941_v62 = vpop.f32.mrf.mxu2  ;;  %v557_v58 = vpop.f32.mrf.mxu3 }
 0x110   : > { %v1943_v59 = vadd.f32 %v557_v58, %v379_v49  ;;  %v382_v61 = vpop.f32.mrf.mxu1  ;;  %v657_v1 = vpop.f32.mrf.mxu0 }
 0x111   : > { %v768_v2 = vadd.f32 %v657_v1, %v1825_v14 }
 0x113   : > { %1372 = vmatmul.msk.f32.gmra.mxu1 %vm209_vm0, %v580_v13 }
 0x114   : > { %1388 = vmatmul.msk.f32.gmra.mxu2 %vm209_vm0, %v810_v4  ;;  %1404 = vmatmul.msk.f32.gmra.mxu3 %vm209_vm0, %v810_v4 }
 0x117   : > { %v1950_v6 = vpop.f32.mrf.mxu2  ;;  %v560_v3 = vpop.f32.mrf.mxu3 }
 0x118   : > { %v1952_v5 = vadd.f32 %v560_v3, %v382_v61  ;;  %v385_v8 = vpop.f32.mrf.mxu1  ;;  %v660_v11 = vpop.f32.mrf.mxu0 }
 0x119   : > { %v770_v12 = vadd.f32 %v660_v11, %v1835_v22  ;;  %v469_v22 = vadd.f32 %v1859_v36, %v1839_v24 }
 0x11b   : > { %1373 = vmatmul.msk.f32.gmra.mxu1 %vm209_vm0, %v581_v26 }
 0x11c   : > { %1389 = vmatmul.msk.f32.gmra.mxu2 %vm209_vm0, %v811_v16  ;;  %1405 = vmatmul.msk.f32.gmra.mxu3 %vm209_vm0, %v811_v16 }
 0x11f   : > { %v1959_v14 = vpop.f32.mrf.mxu2  ;;  %v563_v13 = vpop.f32.mrf.mxu3 }
 0x120   : > { %v1961_v17 = vadd.f32 %v563_v13, %v385_v8  ;;  %v663_v18 = vpop.f32.mrf.mxu0  ;;  %v716_v21 = vpop.f32.mrf.mxu1 }
 0x121   : > { %v772_v25 = vadd.f32 %v663_v18, %v1847_v30  ;;  %v765_v27 = vadd.f32 %v716_v21, %v1807_v63  ;;  %v472_v30 = vadd.f32 %v1871_v43, %v1851_v32 }
 0x127   : > { %v881_v28 = vpop.f32.mrf.mxu2  ;;  %v946_v26 = vpop.f32.mrf.mxu3 }
 0x128   : > { %v994_v29 = vadd.f32 %v881_v28, %v764_v40  ;;  %v995_v35 = vadd.f32 %v946_v26, %v765_v27  ;;  %v666_v37 = vpop.f32.mrf.mxu0  ;;  %v719_v41 = vpop.f32.mrf.mxu1 }
 0x129   : > { %v774_v42 = vadd.f32 %v666_v37, %v469_v22  ;;  %v767_v44 = vadd.f32 %v719_v41, %v1817_v7  ;;  %v475_v7 = vadd.f32 %v1883_v50, %v1863_v39 }
 0x12a   : > { %v1026_v49 = vmul.f32 %v994_v29, %v994_v29  ;;  %v1042_v52 = vmul.f32 %v995_v35, %v995_v35 }
 0x12c   : > { %v1968_v57 = vadd.f32 %v1042_v52, %v1026_v49 }
 0x12f   : > { %v884_v63 = vpop.f32.mrf.mxu2  ;;  %v949_v58 = vpop.f32.mrf.mxu3 }
 0x130   : > { %v996_v61 = vadd.f32 %v884_v63, %v766_v56  ;;  %v997_v24 = vadd.f32 %v949_v58, %v767_v44  ;;  %v669_v36 = vpop.f32.mrf.mxu0  ;;  %v722_v1 = vpop.f32.mrf.mxu1 }
 0x131   : > { %v776_v40 = vadd.f32 %v669_v36, %v472_v30  ;;  %v769_v4 = vadd.f32 %v722_v1, %v1827_v15  ;;  %v478_v15 = vadd.f32 %v1893_v60, %v1875_v46 }
 0x132   : > { %v1027_v3 = vmul.f32 %v996_v61, %v996_v61  ;;  %v1043_v8 = vmul.f32 %v997_v24, %v997_v24 }
 0x134   : > { %v1973_v11 = vadd.f32 %v1043_v8, %v1027_v3 }
 0x137   : > { %v887_v16 = vpop.f32.mrf.mxu2  ;;  %v952_v13 = vpop.f32.mrf.mxu3 }
 0x138   : > { %v998_v18 = vadd.f32 %v887_v16, %v768_v2  ;;  %v999_v32 = vadd.f32 %v952_v13, %v769_v4  ;;  %v672_v43 = vpop.f32.mrf.mxu0  ;;  %v725_v21 = vpop.f32.mrf.mxu1 }
 0x139   : > { %v778_v56 = vadd.f32 %v672_v43, %v475_v7  ;;  %v771_v27 = vadd.f32 %v725_v21, %v1837_v23 }
 0x13a   : > { %v1028_v22 = vmul.f32 %v998_v18, %v998_v18  ;;  %v1044_v28 = vmul.f32 %v999_v32, %v999_v32 }
 0x13c   : > { %v1978_v26 = vadd.f32 %v1044_v28, %v1028_v22 }
 0x13f   : > { %v890_v29 = vpop.f32.mrf.mxu2  ;;  %v955_v35 = vpop.f32.mrf.mxu3 }
 0x140   : > { %v1000_v37 = vadd.f32 %v890_v29, %v770_v12  ;;  %v1001_v39 = vadd.f32 %v955_v35, %v771_v27  ;;  %v675_v50 = vpop.f32.mrf.mxu0  ;;  %v728_v41 = vpop.f32.mrf.mxu1 }
 0x141   : > { %v780_v2 = vadd.f32 %v675_v50, %v478_v15  ;;  %v773_v44 = vadd.f32 %v728_v41, %v1849_v31 }
 0x142   : > { %v1029_v49 = vmul.f32 %v1000_v37, %v1000_v37  ;;  %v1045_v52 = vmul.f32 %v1001_v39, %v1001_v39 }
 0x144   : > { %v1983_v30 = vadd.f32 %v1045_v52, %v1029_v49 }
 0x147   : > { %v893_v23 = vpop.f32.mrf.mxu2  ;;  %v958_v63 = vpop.f32.mrf.mxu3 }
 0x148   : > { %v1002_v58 = vadd.f32 %v893_v23, %v772_v25  ;;  %v1003_v61 = vadd.f32 %v958_v63, %v773_v44  ;;  %v678_v24 = vpop.f32.mrf.mxu0  ;;  %v731_v36 = vpop.f32.mrf.mxu1 }
 0x149   : > { %v782_v46 = vadd.f32 %v678_v24, %v1903_v9  ;;  %v775_v60 = vadd.f32 %v731_v36, %v1861_v38 }
 0x14a   : > { %v1030_v12 = vmul.f32 %v1002_v58, %v1002_v58  ;;  %v1046_v1 = vmul.f32 %v1003_v61, %v1003_v61 }
 0x14c   : > { %v1987_v4 = vadd.f32 %v1046_v1, %v1030_v12 }
 0x14f   : > { %v896_v3 = vpop.f32.mrf.mxu2  ;;  %v961_v31 = vpop.f32.mrf.mxu3 }
 0x150   : > { %v1004_v8 = vadd.f32 %v896_v3, %v774_v42  ;;  %v1005_v7 = vadd.f32 %v961_v31, %v775_v60  ;;  %v734_v16 = vpop.f32.mrf.mxu1  ;;  %v681_v23 = vpop.f32.mrf.mxu0 }
 0x151   : > { %v777_v13 = vadd.f32 %v734_v16, %v1873_v45 }
 0x152   : > { %v1031_v18 = vmul.f32 %v1004_v8, %v1004_v8  ;;  %v1047_v25 = vmul.f32 %v1005_v7, %v1005_v7 }
 0x154   : > { %v1990_v32 = vadd.f32 %v1047_v25, %v1031_v18 }
 0x157   : > { %v899_v43 = vpop.f32.mrf.mxu2  ;;  %v964_v21 = vpop.f32.mrf.mxu3 }
 0x158   : > { %v1006_v9 = vadd.f32 %v899_v43, %v776_v40  ;;  %v1007_v27 = vadd.f32 %v964_v21, %v777_v13  ;;  %v737_v38 = vpop.f32.mrf.mxu1  ;;  %v684_v31 = vpop.f32.mrf.mxu0 }
 0x159   : > { %v779_v22 = vadd.f32 %v737_v38, %v1885_v53 }
 0x15a   : > { %v1032_v28 = vmul.f32 %v1006_v9, %v1006_v9  ;;  %v1048_v15 = vmul.f32 %v1007_v27, %v1007_v27 }
 0x15c   : > { %v1993_v29 = vadd.f32 %v1048_v15, %v1032_v28 }
 0x15f   : > { %v902_v42 = vpop.f32.mrf.mxu2  ;;  %v967_v35 = vpop.f32.mrf.mxu3 }
 0x160   : > { %v1008_v37 = vadd.f32 %v902_v42, %v778_v56  ;;  %v1009_v39 = vadd.f32 %v967_v35, %v779_v22  ;;  %v740_v45 = vpop.f32.mrf.mxu1  ;;  %v687_v38 = vpop.f32.mrf.mxu0  ;;  %v786_v22 = vadd.f32 %v684_v31, %v1923_v33 }
 0x161   : > { %v781_v50 = vadd.f32 %v740_v45, %v1895_v0 }
 0x162   : > { %v1033_v41 = vmul.f32 %v1008_v37, %v1008_v37  ;;  %v1049_v44 = vmul.f32 %v1009_v39, %v1009_v39 }
 0x164   : > { %v1996_v49 = vadd.f32 %v1049_v44, %v1033_v41 }
 0x167   : > { %v905_v40 = vpop.f32.mrf.mxu2  ;;  %v970_v52 = vpop.f32.mrf.mxu3 }
 0x168   : > { %v1010_v63 = vadd.f32 %v905_v40, %v780_v2  ;;  %v1011_v53 = vadd.f32 %v970_v52, %v781_v50  ;;  %v743_v58 = vpop.f32.mrf.mxu1  ;;  %v784_v2 = vadd.f32 %v681_v23, %v1913_v19  ;;  %v788_v50 = vadd.f32 %v687_v38, %v1932_v47  ;;  %v690_v41 = vpop.f32.mrf.mxu0 }
 0x169   : > { %v783_v61 = vadd.f32 %v743_v58, %v1905_v10  ;;  %v493_v58 = vadd.f32 %v1941_v62, %v1786_v51 }
 0x16a   : > { %v1034_v24 = vmul.f32 %v1010_v63, %v1010_v63  ;;  %v1050_v36 = vmul.f32 %v1011_v53, %v1011_v53 }
 0x16c   : > { %v1999_v60 = vadd.f32 %v1050_v36, %v1034_v24  ;;  %v790_v24 = vadd.f32 %v690_v41, %v493_v58 }
 0x16f   : > { %v908_v56 = vpop.f32.mrf.mxu2  ;;  %v973_v12 = vpop.f32.mrf.mxu3 }
 0x170   : > { %v1012_v1 = vadd.f32 %v908_v56, %v782_v46  ;;  %v1013_v0 = vadd.f32 %v973_v12, %v783_v61  ;;  %v746_v3 = vpop.f32.mrf.mxu1 }
 0x171   : > { %v785_v13 = vadd.f32 %v746_v3, %v1915_v20 }
 0x172   : > { %v1035_v8 = vmul.f32 %v1012_v1, %v1012_v1  ;;  %v1051_v7 = vmul.f32 %v1013_v0, %v1013_v0  ;;  %v693_v0 = vpop.f32.mrf.mxu0 }
 0x174   : > { %v2001_v16 = vadd.f32 %v1051_v7, %v1035_v8  ;;  %v496_v8 = vadd.f32 %v1950_v6, %v1795_v54 }
 0x177   : > { %v911_v18 = vpop.f32.mrf.mxu2  ;;  %v976_v10 = vpop.f32.mrf.mxu3 }
 0x178   : > { %v1014_v25 = vadd.f32 %v911_v18, %v784_v2  ;;  %v1015_v43 = vadd.f32 %v976_v10, %v785_v13  ;;  %v749_v21 = vpop.f32.mrf.mxu1  ;;  %v792_v2 = vadd.f32 %v693_v0, %v496_v8 }
 0x179   : > { %v787_v28 = vadd.f32 %v749_v21, %v1925_v34 }
 0x17a   : > { %v1036_v9 = vmul.f32 %v1014_v25, %v1014_v25  ;;  %v1052_v27 = vmul.f32 %v1015_v43, %v1015_v43  ;;  %v696_v43 = vpop.f32.mrf.mxu0 }
 0x17c   : > { %v1068_v46 = vadd.f32 %v1052_v27, %v1036_v9  ;;  %v499_v9 = vadd.f32 %v1959_v14, %v1797_v55  ;;  %v1074_v55 = vld [vmem:[%s2098_s2] sm:$0xff]  ;;  %v1075_v14 = vld [vmem:[%s2098_s2 + $0x8] sm:$0xff] }
 0x17e   : > { %v794_v38 = vadd.f32 %v696_v43, %v499_v9 }
 0x17f   : > { %v914_v15 = vpop.f32.mrf.mxu2  ;;  %v979_v42 = vpop.f32.mrf.mxu3 }
 0x180   : > { %v1016_v35 = vadd.f32 %v914_v15, %v786_v22  ;;  %v1017_v37 = vadd.f32 %v979_v42, %v787_v28  ;;  %v752_v19 = vpop.f32.mrf.mxu1 }
 0x181   : > { %v789_v44 = vadd.f32 %v752_v19, %v1934_v48 }
 0x182   : > { %v1037_v39 = vmul.f32 %v1016_v35, %v1016_v35  ;;  %v1053_v20 = vmul.f32 %v1017_v37, %v1017_v37 }
 0x184   : > { %v1069_v45 = vadd.f32 %v1053_v20, %v1037_v39 }
 0x187   : > { %v917_v40 = vpop.f32.mrf.mxu2  ;;  %v982_v52 = vpop.f32.mrf.mxu3 }
 0x188   : > { %v1018_v23 = vadd.f32 %v917_v40, %v788_v50  ;;  %v1019_v63 = vadd.f32 %v982_v52, %v789_v44  ;;  %v755_v33 = vpop.f32.mrf.mxu1 }
 0x189   : > { %v791_v36 = vadd.f32 %v755_v33, %v1943_v59 }
 0x18a   : > { %v1038_v53 = vmul.f32 %v1018_v23, %v1018_v23  ;;  %v1054_v34 = vmul.f32 %v1019_v63, %v1019_v63 }
 0x18c   : > { %v1070_v61 = vadd.f32 %v1054_v34, %v1038_v53 }
 0x18f   : > { %v920_v56 = vpop.f32.mrf.mxu2  ;;  %v985_v12 = vpop.f32.mrf.mxu3 }
 0x190   : > { %v1020_v47 = vadd.f32 %v920_v56, %v790_v24  ;;  %v1021_v1 = vadd.f32 %v985_v12, %v791_v36  ;;  %v758_v48 = vpop.f32.mrf.mxu1  ;;  %v1550_v12 = vmov 4096.0  }
 0x191   : > { %v793_v13 = vadd.f32 %v758_v48, %v1952_v5 }
 0x192   : > { %v1039_v3 = vmul.f32 %v1020_v47, %v1020_v47  ;;  %v1055_v31 = vmul.f32 %v1021_v1, %v1021_v1  ;;  %v1551_v47 = vmov 4095.0  }
 0x194   : > { %v1071_v7 = vadd.f32 %v1055_v31, %v1039_v3 }
 0x197   : > { %v923_v51 = vpop.f32.mrf.mxu2  ;;  %v988_v62 = vpop.f32.mrf.mxu3 }
 0x198   : > { %v1022_v18 = vadd.f32 %v923_v51, %v792_v2  ;;  %v1023_v10 = vadd.f32 %v988_v62, %v793_v13  ;;  %v761_v21 = vpop.f32.mrf.mxu1 }
 0x199   : > { %v795_v22 = vadd.f32 %v761_v21, %v1961_v17  ;;  %v1076_v17 = vld [vmem:[%s2098_s2 + $0x10] sm:$0xff] }
 0x19a   : > { %v1040_v59 = vmul.f32 %v1022_v18, %v1022_v18  ;;  %v1056_v25 = vmul.f32 %v1023_v10, %v1023_v10 }
 0x19c   : > { %v1072_v27 = vadd.f32 %v1056_v25, %v1040_v59 }
 0x19f   : > { %v926_v54 = vpop.f32.mrf.mxu2  ;;  %v991_v6 = vpop.f32.mrf.mxu3 }
 0x1a0   : > { %v1024_v28 = vadd.f32 %v926_v54, %v794_v38  ;;  %v1025_v15 = vadd.f32 %v991_v6, %v795_v22 }
 0x1a2   : > { %v1041_v5 = vmul.f32 %v1024_v28, %v1024_v28  ;;  %v1057_v42 = vmul.f32 %v1025_v15, %v1025_v15 }
 0x1a4   : > { %v1073_v35 = vadd.f32 %v1057_v42, %v1041_v5 }
 0x1a6   : > { %1078 = vmatpush.xpose.msra.mxu0 %v1073_v35 }
 0x1aa   : > { %1079 = vmatpush.xpose.msra.mxu0 %v1072_v27 }
 0x1ae   : > { %1080 = vmatpush.xpose.msra.mxu0 %v1071_v7 }
 0x1b2   : > { %1081 = vmatpush.xpose.msra.mxu0 %v1070_v61 }
 0x1b6   : > { %1082 = vmatpush.xpose.msra.mxu0 %v1069_v45 }
 0x1ba   : > { %1083 = vmatpush.xpose.msra.mxu0 %v1068_v46 }
 0x1be   : > { %1084 = vmatpush.xpose.msra.mxu0 %v2001_v16 }
 0x1c2   : > { %1085 = vmatpush.xpose.msra.mxu0 %v1999_v60 }
 0x1c6   : > { %1086 = vmatpush.xpose.msra.mxu0 %v1996_v49 }
 0x1ca   : > { %1087 = vmatpush.xpose.msra.mxu0 %v1993_v29 }
 0x1ce   : > { %1088 = vmatpush.xpose.msra.mxu0 %v1990_v32 }
 0x1d2   : > { %1089 = vmatpush.xpose.msra.mxu0 %v1987_v4 }
 0x1d6   : > { %1090 = vmatpush.xpose.msra.mxu0 %v1983_v30 }
 0x1da   : > { %1091 = vmatpush.xpose.msra.mxu0 %v1978_v26 }
 0x1de   : > { %1092 = vmatpush.xpose.msra.mxu0 %v1973_v11  ;;  %v1077_v11 = vld [vmem:[%s2098_s2 + $0x18] sm:$0xff] }
 0x1e2   : > { %1093 = vmatpush.xpose.msra.mxu0 %v1968_v57 }
 0x1e5   : > { %1094 = vmatmul.f32.vlgmr.msra.gmra.mxu0 %v1074_v55 }
 0x1ed   : > { %1097 = vmatmul.f32.gmra.mxu0 %v1075_v14 }
 0x1f5   : > { %1100 = vmatmul.f32.gmra.mxu0 %v1076_v17 }
 0x1fd   : > { %1103 = vmatmul.f32.gmra.mxu0 %v1077_v11 }
 0x262   : > { %v1095_v57 = vpop.f32.mrf.mxu0 }
 0x263   : > { %v1096_v4 = vadd.f32 1.0, %v1095_v57 }
 0x26a   : > { %v1098_v26 = vpop.f32.mrf.mxu0 }
 0x26b   : > { %v1099_v30 = vadd.f32 1.0, %v1098_v26 }
 0x26d   : > { %1472 = vlog2.f32 %v1099_v30 }
 0x26e   : > { %1474 = vlog2.f32 %v1096_v4 }
 0x272   : > { %v1101_v32 = vpop.f32.mrf.mxu0 }
 0x273   : > { %v1102_v29 = vadd.f32 1.0, %v1101_v32  ;;  %v1473_v49 = vpop.eup %1472 }
 0x274   : > { %v1475_v60 = vpop.eup %1474  ;;  %v1110_v19 = vmul.f32 0.6931472, %v1473_v49 }
 0x275   : > { %1476 = vlog2.f32 %v1102_v29  ;;  %v1108_v39 = vmul.f32 0.6931472, %v1475_v60 }
 0x276   : > { %v2040_v45 = vmul.f32 0.4342945, %v1110_v19 }
 0x277   : > { %v2042_v50 = vmul.f32 0.4342945, %v1108_v39 }
 0x278   : > { %v1132_v53 = vmul.f32 %v2040_v45, %v2040_v45 }
 0x279   : > { %v1119_v52 = vadd.f32 %v2040_v45, %v2042_v50  ;;  %v1131_v34 = vmul.f32 %v2042_v50, %v2042_v50 }
 0x27a   : > { %v1104_v16 = vpop.f32.mrf.mxu0 }
 0x27b   : > { %v1477_v46 = vpop.eup %1476  ;;  %v1105_v37 = vadd.f32 1.0, %v1104_v16  ;;  %v1135_v24 = vadd.f32 %v1132_v53, %v1131_v34 }
 0x27c   : > { %v1112_v20 = vmul.f32 0.6931472, %v1477_v46 }
 0x27d   : > { %1478 = vlog2.f32 %v1105_v37 }
 0x27e   : > { %v2044_v41 = vmul.f32 0.4342945, %v1112_v20  ;;  %1480 = vrcp.f32 %v1550_v12 }
 0x27f   : > { %1482 = vrcp.f32 %v1551_v47 }
 0x280   : > { %v1120_v63 = vadd.f32 %v1119_v52, %v2044_v41  ;;  %v1133_v58 = vmul.f32 %v2044_v41, %v2044_v41 }
 0x282   : > { %v1136_v36 = vadd.f32 %v1135_v24, %v1133_v58 }
 0x283   : > { %v1479_v44 = vpop.eup %1478 }
 0x284   : > { %v1114_v40 = vmul.f32 0.6931472, %v1479_v44  ;;  %v1481_v1 = vpop.eup %1480 }
 0x285   : > { %v1483_v48 = vpop.eup %1482  ;;  %v1148_v8 = vmul.f32 4096.0, %v1481_v1  ;;  %vm1152_vm1 = vweird.f32 %v1481_v1 }
 0x286   : > { %v2048_v23 = vmul.f32 0.4342945, %v1114_v40  ;;  %v1160_v7 = vmul.f32 4095.0, %v1483_v48  ;;  %vm1164_vm2 = vweird.f32 %v1483_v48 }
 0x287   : > { %v1149_v51 = vsub.f32 1.0, %v1148_v8 }
 0x288   : > { %v1121_v33 = vadd.f32 %v1120_v63, %v2048_v23  ;;  %v1134_v61 = vmul.f32 %v2048_v23, %v2048_v23  ;;  %v1161_v18 = vsub.f32 1.0, %v1160_v7 }
 0x289   : > { %v1150_v21 = vmul.f32 %v1481_v1, %v1149_v51 }
 0x28a   : > { %1122 = vadd.xlane.f32.xlu0 %v1121_v33  ;;  %v1137_v56 = vadd.f32 %v1136_v36, %v1134_v61  ;;  %v1162_v9 = vmul.f32 %v1483_v48, %v1161_v18 }
 0x28b   : > { %v1151_v22 = vadd.f32 %v1481_v1, %v1150_v21 }
 0x28c   : > { %v1163_v54 = vadd.f32 %v1483_v48, %v1162_v9 }
 0x28d   : > { %v1153_v15 = vsel %vm1152_vm1, %v1481_v1, %v1151_v22 }
 0x28e   : > { %v1165_v5 = vsel %vm1164_vm2, %v1483_v48, %v1163_v54 }
 0x292   : > { %1138 = vadd.xlane.f32.xlu0 %v1137_v56 }
 0x2fd   : > { %v1123_v0 = vpop.xlane.xlu0 %1122 }
 0x2fe   : > { %v1124_v3 = vrot.slane %v1123_v0, 4 }
 0x300   : > { %v1125_v31 = vadd.f32 %v1124_v3, %v1123_v0 }
 0x302   : > { %v1126_v2 = vrot.slane %v1125_v31, 2 }
 0x304   : > { %v1127_v13 = vadd.f32 %v1126_v2, %v1125_v31 }
 0x305   : > { %v1139_v62 = vpop.xlane.xlu0 %1138 }
 0x306   : > { %v1140_v10 = vrot.slane %v1139_v62, 4  ;;  %v1128_v59 = vrot.slane %v1127_v13, 1 }
 0x308   : > { %v1141_v25 = vadd.f32 %v1140_v10, %v1139_v62  ;;  %v1129_v43 = vadd.f32 %v1128_v59, %v1127_v13 }
 0x30a   : > { %v1142_v27 = vrot.slane %v1141_v25, 2  ;;  %1419 = vpush %v1129_v43 }
 0x30c   : > { %v1143_v38 = vadd.f32 %v1142_v27, %v1141_v25 }
 0x30e   : > { %v1144_v6 = vrot.slane %v1143_v38, 1 }
 0x310   : > { %v1145_v28 = vadd.f32 %v1144_v6, %v1143_v38 }
 0x312   : > { %1421 = vpush %v1145_v28 }
 0x313   : > { %1423 = vpush %v1153_v15 }
 0x314   : > { %1425 = vpush %v1165_v5 }
 0x33b   : > { %s1420_s6 = spop %1419 }
 0x343   : > { %s1422_s7 = spop %1421 }
 0x344   : > { %s1424_s8 = spop %1423 }
 0x345   : > { %s1155_s9 = smul.f32 %s1424_s8, %s1420_s6  ;;  %s1426_s17 = spop %1425 }
 0x346   : > { %s1209_s6 = sshll.u32 %s1206_s29, 4  ;;  %s1210_s6 = int_to_ptr.hbm [resolvable:$true] %s1209_s6 }
 0x347   : > { %s1156_s10 = smul.f32 4096.0, %s1155_s9  ;;  %v1180_v30 = vstv %s1155_s9 }
 0x348   : > { %v1181_v4 = vsub.f32 %v2042_v50, %v1180_v30  ;;  %v1182_v32 = vsub.f32 %v2040_v45, %v1180_v30  ;;  %v1183_v29 = vsub.f32 %v2044_v41, %v1180_v30  ;;  %v1184_v49 = vsub.f32 %v2048_v23, %v1180_v30 }
 0x349   : > { %s1157_s11 = smul.f32 %s1156_s10, %s1155_s9 }
 0x34b   : > { %s1158_s19 = ssub.f32 %s1422_s7, %s1157_s11  ;;  %s1500_s7 = sshra.s32 %s1210_s6, 4  ;;  %s1501_s7 = int_to_ptr.hbm [resolvable:$true] %s1500_s7 }
 0x34c   : > { %s1502_s8 = scalar_lea.hbm %s1501_s7, 32  ;;  %s1506_s11 = scalar_lea.hbm %s2099_s3, 64 }
 0x34d   : > { %s1167_s20 = smul.f32 %s1426_s17, %s1158_s19  ;;  %p1503_p11 = scmp.ne.s32.totalorder %s1501_s7, %s1502_s8 }
 0x34e   : > { %p1507_p0 = scmp.lt.s32.totalorder %s1501_s7, %s2099_s3  ;;  %p1508_p1 = scmp.lt.s32.totalorder %s1506_s11, %s1502_s8 }
 0x34f   : > { %v1168_v42 = vstv %s1167_s20  ;;  %p1504_p12 = pnand %p1503_p11, %p1612_p5 }
 0x350   : > { %1484 = vrsqrt.f32 %v1168_v42  ;;  %vm1175_vm4 = vweird.f32 %v1168_v42  ;;  %p1509_p2 = por %p1508_p1, %p1507_p0 }
 0x351   : > { %p1505_p13 = pneg %p1504_p12 }
 0x353   : > { %p1510_p3 = pnand %p1509_p2, %p1505_p13 }
 0x356   : > { %v1485_v35 = vpop.eup %1484 }
 0x357   : > { %v1170_v55 = vmul.f32 %v1485_v35, %v1168_v42  ;;  %vm1176_vm3 = vweird.f32 %v1485_v35 }
 0x358   : > { %vm1177_vm5 = vmor %vm1175_vm4, %vm1176_vm3 }
 0x359   : > { %v1171_v14 = vmul.f32 %v1485_v35, %v1170_v55 }
 0x35b   : > { %v1172_v17 = vmul.f32 0.5, %v1171_v14 }
 0x35d   : > { %v1173_v11 = vsub.f32 1.5, %v1172_v17 }
 0x35f   : > { %v1174_v57 = vmul.f32 %v1485_v35, %v1173_v11 }
 0x361   : > { %v1178_v26 = vsel %vm1177_vm5, %v1485_v35, %v1174_v57 }
 0x362   : > { %1427 = vpush %v1178_v26 }
 0x393   : > { %s1428_s30 = spop %1427 }
 0x394   : > { %v1185_v60 = vstv %s1428_s30 }
 0x395   : > { %v1186_v16 = vmul.f32 %v1185_v60, %v1181_v4  ;;  %v1187_v46 = vmul.f32 %v1185_v60, %v1182_v32  ;;  %v1188_v37 = vmul.f32 %v1185_v60, %v1183_v29  ;;  %v1189_v19 = vmul.f32 %v1185_v60, %v1184_v49 }
 0x397   : > { %1190 = vst [vmem:[%s163_s4] sm:$0xff] %v1186_v16 }
 0x398   : > { %1191 = vst [vmem:[%s163_s4 + $0x8] sm:$0xff] %v1187_v46 }
 0x399   : > { %1192 = vst [vmem:[%s163_s4 + $0x10] sm:$0xff] %v1188_v37 }
 0x39a   : > { %1193 = vst [vmem:[%s163_s4 + $0x18] sm:$0xff] %v1189_v19 }
 0x39b   : > { %1513 = shalt.err (!%p1510_p3)
}
 0x39c   : > { %s1552_s20 = smov 128   ;;  %s1553_s25 = smov 8  }
 0x39d   : > { %1429 = dma.vmem_to_hbm [thread:$0]  (%p1612_p5), %s1208_s5, 512, %s1210_s6, %s1195_s16, %s1552_s20, %s1552_s20, %s1553_s25  }
 0x39e PF: > { %p1435_p4 = scmp.ge.s32.totalorder %s1548_s15, 2  ;;  %s1224_s24 = sand.u32 1, %s1536_s12  }
 0x39f   : > { %s1225_s26 = scalar_lea.sflag [#allocation3], %s1224_s24 }
 0x3a0   : > { %p1432_p7 = pnand %p1435_p4, %p1616_p6 }
 0x3a2   : > { %p1433_p8 = pneg %p1432_p7 }
 0x3a4   : > { %1531 = dma.done.wait (%p1433_p8), %s1225_s26, 512  }
 0x3a5   : > { %1533 = vsyncadd (%p1433_p8), %s1225_s26, 4294966784  ;;  %p13_p9 = scmp.ge.s32.totalorder %s1599_s18, 4   ;;  %s2102_s12 = smov %s1540_s13 }
 0x3a6   : > { %s2103_s13 = smov %s1544_s14  ;;  %s2104_s14 = smov %s1610_s21 }
 0x3a7   : > { %s2105_s15 = smov %s1599_s18  ;;  %15 = sbr.rel (!%p13_p9) target bundleno = 3 (0x3), region = 67 }
 0x3ac   :  { %1231 = vsyncpa [#allocation3], 1 }
 0x3ad   :  { %1233 = vsyncpa [#allocation3 + $0x1], 1 }

</bundles_post_ra>
